<compile_context>
chip_gen: v6e
topology: v6e:2x2x1
jax: 0.10.0
libtpu: 0.0.40
codegen_flags: <defaults>
</compile_context>

<pallas_src>
import functools

import jax
import jax.numpy as jnp
from jax import lax
from jax.experimental import pallas as pl
from jax.experimental.pallas import tpu as pltpu


def _round_up(n, m):
    return ((n + m - 1) // m) * m


def _rbf_kernel(x_ref, ft_ref, fnegsq_ref, o_ref, *, neg_inv_two_sigma_sq):
    # x_ref:      (TN, D) tile of inputs
    # ft_ref:     (D, M)  filter bank, transposed and pre-scaled by 2c (resident)
    # fnegsq_ref: (1, M)  precomputed -c * ||f_j||^2 (resident)
    # o_ref:      (TN, M) output tile
    x = x_ref[...].astype(jnp.float32)                               # (TN, D)

    # -c * ||x_i||^2 (VPU + lane reduce, once per tile)
    x_neg_sq = jnp.sum(x * x, axis=-1, keepdims=True) * neg_inv_two_sigma_sq  # (TN, 1)

    # 2c * (x . f) on the MXU; RHS is already (K, M) lane-dense, no transpose.
    xf = lax.dot_general(
        x, ft_ref[...],
        dimension_numbers=(((1,), (0,)), ((), ())),
        precision=lax.Precision.HIGHEST,
        preferred_element_type=jnp.float32,
    )                                                                # (TN, M)

    # t = -c * ||x - f||^2 ; true squared distance >= 0 so clamp t at 0.
    t = x_neg_sq + fnegsq_ref[...] + xf
    t = jnp.minimum(t, 0.0)

    o_ref[...] = jnp.exp(t).astype(o_ref.dtype)


def rbf_forward(x, filters, sigma, *, tile_n=1024):
    """exp(-squared_distance_matrix(x, filters) / (2 * sigma**2)) via Pallas."""
    N, D = x.shape
    M, Df = filters.shape
    assert D == Df, "feature dims must match"
    out_dtype = x.dtype

    # TODO(synk): sigma is baked in as a Python constant at trace time; if it
    # ever becomes a traced/learned parameter it must be passed as an SMEM scalar.
    c = 1.0 / (2.0 * float(sigma) ** 2)

    # Large N tiles (sublane-aligned).  Keep >= 2 grid steps when N allows so
    # that on v7x both TensorCores get work along the "parallel" axis.
    tile_n_eff = min(tile_n, _round_up(N, 8))
    if N > 8 and pl.cdiv(N, tile_n_eff) < 2:
        tile_n_eff = max(8, _round_up(pl.cdiv(N, 2), 8))
    grid = (pl.cdiv(N, tile_n_eff),)

    # Hoisted out of the per-step body, done once in XLA on the tiny filter bank:
    f32_filters = filters.astype(jnp.float32)
    f_neg_sq = -(jnp.sum(f32_filters * f32_filters, axis=-1)[None, :] * c)  # (1, M)
    f_t_scaled = f32_filters.T * (2.0 * c)                                   # (D, M)

    kernel = functools.partial(_rbf_kernel, neg_inv_two_sigma_sq=-c)

    out = pl.pallas_call(
        kernel,
        out_shape=jax.ShapeDtypeStruct((N, M), out_dtype),
        grid_spec=pltpu.PrefetchScalarGridSpec(
            num_scalar_prefetch=0,
            grid=grid,
            in_specs=[
                # tile of inputs: (tile_n_eff, D), marches down the N axis
                pl.BlockSpec((tile_n_eff, D), lambda i: (i, 0)),
                # transposed + pre-scaled filter bank, resident across the grid
                pl.BlockSpec((D, M), lambda i: (0, 0)),
                # precomputed -c*||f||^2, resident across the grid
                pl.BlockSpec((1, M), lambda i: (0, 0)),
            ],
            out_specs=pl.BlockSpec((tile_n_eff, M), lambda i: (i, 0)),
        ),
        compiler_params=pltpu.CompilerParams(
            dimension_semantics=("parallel",),
        ),
    )(x, f_t_scaled, f_neg_sq)

    return out


def rbf_reference(x, filters, sigma):
    # pure-JAX reference for the same semantics (direct differencing)
    d2 = jnp.sum((x[:, None, :] - filters[None, :, :]) ** 2, axis=-1)
    return jnp.exp(-d2 / (2.0 * sigma ** 2))


if __name__ == "__main__":
    key = jax.random.PRNGKey(0)
    kx, kf = jax.random.split(key)

    N, D, M = 64, 32, 128   # N samples, D features, M RBF filters
    sigma = 1.5

    x = jax.random.normal(kx, (N, D), dtype=jnp.float32)
    # deterministic parameter init (synthetic, not a checkpoint load)
    filters = jax.random.normal(kf, (M, D), dtype=jnp.float32)

    out = rbf_forward(x, filters, sigma)
    out = jax.block_until_ready(out)

    ref = rbf_reference(x, filters, sigma)
    assert out.shape == (N, M)
    assert jnp.allclose(out, ref, atol=1e-5, rtol=1e-5), "mismatch vs reference"

    print("KERNEL_OK")
</pallas_src>

<mosaic_0001>
module attributes {stable_mosaic.version = 11 : i64} {
  func.func @_rbf_kernel(%arg0: i32, %arg1: memref<32x32xf32, #tpu.memory_space<vmem>>, %arg2: memref<32x128xf32, #tpu.memory_space<vmem>>, %arg3: memref<1x128xf32, #tpu.memory_space<vmem>>, %arg4: memref<32x128xf32, #tpu.memory_space<vmem>>) attributes {dimension_semantics = [#tpu.dimension_semantics<parallel>], iteration_bounds = array<i64: 2>, scalar_prefetch = 0 : i64, scratch_operands = 0 : i64, tpu.core_type = #tpu.core_type<tc>, window_params = [{transform_indices = @transform_0, window_bounds = array<i64: 32, 32>}, {pipeline_mode = #tpu.pipeline_mode<synchronous>, transform_indices = @transform_1, window_bounds = array<i64: 32, 128>}, {pipeline_mode = #tpu.pipeline_mode<synchronous>, transform_indices = @transform_2, window_bounds = array<i64: 1, 128>}, {transform_indices = @transform_3, window_bounds = array<i64: 32, 128>}]} {
    %c0 = arith.constant 0 : index
    %c0_0 = arith.constant 0 : index
    %0 = vector.load %arg1[%c0, %c0_0] : memref<32x32xf32, #tpu.memory_space<vmem>>, vector<32x32xf32>
    %1 = arith.mulf %0, %0 : vector<32x32xf32>
    %cst = arith.constant dense<0.000000e+00> : vector<32xf32>
    %2 = vector.multi_reduction <add>, %1, %cst [1] : vector<32x32xf32> to vector<32xf32>
    %3 = vector.shape_cast %2 : vector<32xf32> to vector<32x1xf32>
    %cst_1 = arith.constant -0.222222224 : f32
    %4 = vector.broadcast %cst_1 : f32 to vector<32x1xf32>
    %5 = arith.mulf %3, %4 : vector<32x1xf32>
    %c0_2 = arith.constant 0 : index
    %c0_3 = arith.constant 0 : index
    %6 = vector.load %arg2[%c0_2, %c0_3] : memref<32x128xf32, #tpu.memory_space<vmem>>, vector<32x128xf32>
    %cst_4 = arith.constant dense<0.000000e+00> : vector<32x128xf32>
    %7 = tpu.matmul %0, %6, %cst_4 {dimension_numbers = #tpu.dot_dimension_numbers<[1], [0], [0], [1], [0, 0, 1, 1], [], []>, precision = #tpu.contract_precision<fp32>} : vector<32x32xf32>, vector<32x128xf32>, vector<32x128xf32> -> vector<32x128xf32>
    %c0_5 = arith.constant 0 : index
    %c0_6 = arith.constant 0 : index
    %8 = vector.load %arg3[%c0_5, %c0_6] : memref<1x128xf32, #tpu.memory_space<vmem>>, vector<1x128xf32>
    %9 = vector.broadcast %5 : vector<32x1xf32> to vector<32x128xf32>
    %10 = vector.broadcast %8 : vector<1x128xf32> to vector<32x128xf32>
    %11 = arith.addf %9, %10 : vector<32x128xf32>
    %12 = arith.addf %11, %7 : vector<32x128xf32>
    %cst_7 = arith.constant 0.000000e+00 : f32
    %13 = vector.broadcast %cst_7 : f32 to vector<32x128xf32>
    %14 = arith.minimumf %12, %13 : vector<32x128xf32>
    %15 = math.exp %14 : vector<32x128xf32>
    %c0_8 = arith.constant 0 : index
    %c0_9 = arith.constant 0 : index
    %16 = vector.load %arg4[%c0_8, %c0_9] : memref<32x128xf32, #tpu.memory_space<vmem>>, vector<32x128xf32>
    tpu.vector_store %arg4[%c0_8, %c0_9], %15 {strides = array<i32>} : memref<32x128xf32, #tpu.memory_space<vmem>>, vector<32x128xf32>,
    return
  }
  func.func @transform_0(%arg0: i32) -> (i32, i32) {
    %c0_i32 = arith.constant 0 : i32
    %c0_i32_0 = arith.constant 0 : i32
    return %arg0, %c0_i32 : i32, i32
  }
  func.func @transform_1(%arg0: i32) -> (i32, i32) {
    %c0_i32 = arith.constant 0 : i32
    %c0_i32_0 = arith.constant 0 : i32
    %c0_i32_1 = arith.constant 0 : i32
    return %c0_i32, %c0_i32_0 : i32, i32
  }
  func.func @transform_2(%arg0: i32) -> (i32, i32) {
    %c0_i32 = arith.constant 0 : i32
    %c0_i32_0 = arith.constant 0 : i32
    %c0_i32_1 = arith.constant 0 : i32
    return %c0_i32, %c0_i32_0 : i32, i32
  }
  func.func @transform_3(%arg0: i32) -> (i32, i32) {
    %c0_i32 = arith.constant 0 : i32
    %c0_i32_0 = arith.constant 0 : i32
    return %arg0, %c0_i32 : i32, i32
  }
}

</mosaic_0001>

<bundles_post_ra>
// kernel: tpu_custom_call.1
= control target key start
LH: loop header
LB: loop body
LE: loop exit
PB: predicated region body
PF: predicated region fallthrough
CT: control target
= control target key end

     0   :  { %8 = vsyncpa [#allocation3], 0  ;;  %s1447_s0 = inlined_call_operand.vmem [shape: f32[64,32], index: 0, kind: input, shape index: {}]   ;;  %s1448_s1 = inlined_call_operand.vmem [shape: f32[32,128], index: 1, kind: input, shape index: {}]   ;;  %s1449_s2 = inlined_call_operand.vmem [shape: f32[1,128], index: 2, kind: input, shape index: {}]   ;;  %s1450_s3 = inlined_call_operand.hbm [shape: f32[64,128], index: 3, kind: output, shape index: {}]  }
   0x1   :  { %10 = vsyncpa [#allocation3 + $0x1], 0  ;;  %s1214_s12 = smov 0   ;;  %s1216_s13 = smov 0  }
   0x2   :  { %s1218_s14 = smov 0   ;;  %s1220_s15 = smov 0  }
   0x3 LB: > { %s1235_s16 = sadd.s32 4294967295, %s1189_s15   ;;  %s934_s17 = sadd.s32 4294967294, %s1189_s15   ;;  %s1189_s15 = sphi %s1220_s15, %s1456_s15   ;;  %s1185_s14 = sphi %s1218_s14, %s1455_s14   ;;  %s1181_s13 = sphi %s1216_s13, %s1454_s13   ;;  %s1177_s12 = sphi %s1214_s12, %s1453_s12  }
   0x4   : > { %s1239_s18 = sadd.s32 1, %s1189_s15   ;;  %s91_s19 = sadd.s32 1, %s1185_s14 }
   0x5   : > { %s88_s20 = ssub.s32 %s1189_s15, %s1239_s18  ;;  %p101_p0 = scmp.ne.s32.totalorder %s1185_s14, %s1181_s13 }
   0x6   : > { %p89_p1 = scmp.eq.s32.totalorder %s88_s20, 0  ;;  %p102_p2 = scmp.eq.s32.totalorder %s1235_s16, 1 }
   0x7   : > { %p107_p3 = scmp.ne.s32.totalorder %s1181_s13, %s1177_s12  ;;  %p108_p4 = scmp.eq.s32.totalorder %s934_s17, 1 }
   0x8   : > { %s1250_s21 = scalar_select %p89_p1, %s1185_s14, %s91_s19  }
   0x9   : > { %p1252_p5 = por %p102_p2, %p101_p0  ;;  %p1256_p6 = por %p108_p4, %p107_p3 }
   0xa   : > { %p937_p7 = scmp.ge.s32.totalorder %s1189_s15, 1  ;;  %p141_p8 = scmp.lt.s32.totalorder %s1189_s15, 3 }
   0xc   : > { %p142_p9 = pnand %p937_p7, %p141_p8 }
   0xd   : > { %s939_s30 = sshll.u32 (!%p142_p9), %s1235_s16, 2  ;;  %s162_s17 = sand.u32 (!%p142_p9), 1, %s1181_s13  }
   0xe   : > { %145 = sbr.rel (%p142_p9) target bundleno = 298 (0x12a), region = 32  ;;  %p166_p10 = scmp.lt.s32.totalorder (!%p142_p9), %s939_s30, 7 }
   0xf   : > { %s938_s19 = sshll.u32 (!%p142_p9), %s162_s17, 5  ;;  %s947_s24 = sshll.u32 (!%p142_p9), %s1235_s16, 9 }
  0x10   : > { %s164_s20 = scalar_lea.vmem (!%p142_p9), [#allocation2], %s938_s19  ;;  %s1403_s28 = scalar_lea.hbm (!%p142_p9), %s1450_s3, %s947_s24 }
  0x11   : > { %s872_s25 = sshll.u32 (!%p142_p9), %s164_s20, 4  ;;  %s1407_s29 = scalar_lea.sflag (!%p142_p9), [#allocation3], %s162_s17  ;;  %s1405_s25 = int_to_ptr.vmem [resolvable:$true] %s872_s25 }
  0x12   : > { %s1129_s16 = scalar_lea.vmem (!%p142_p9), %s1405_s25, 512 }
  0x13   : > { %v200_v0 = vld [vmem:[%s1448_s1 + $0x18] sm:$0xff]  ;;  %v199_v1 = vld [vmem:[%s1448_s1 + $0x10] sm:$0xff]  ;;  %v198_v2 = vld [vmem:[%s1448_s1 + $0x8] sm:$0xff]  ;;  %s1458_s30 = smov (!%p166_p10, %s939_s30), 7  ;;  %vm180_vm0 = vcmask 261120   ;;  %p1130_p11 = scmp.ne.s32.totalorder %s1405_s25, %s1129_s16 }
  0x14   : > { %v1272_v3 = vand.u32 4294901760, %v200_v0  ;;  %v1274_v4 = vand.u32 4294901760, %v199_v1  ;;  %v1276_v5 = vand.u32 4294901760, %v198_v2  ;;  %v197_v6 = vld [vmem:[%s1448_s1] sm:$0xff]  ;;  %s940_s6 = sshll.u32 %s1458_s30, 3  ;;  %s1191_s30 = smov [#allocation2]  }
  0x15   : > { %v1281_v7 = vand.u32 4294901760, %v197_v6  ;;  %s169_s9 = scalar_lea.vmem %s1447_s0, %s940_s6  ;;  %p1131_p12 = pnand %p1130_p11, %p1252_p5 }
  0x16   : > { %996 = vmatprep.subr.mxu0 %v1272_v3  ;;  %v1285_v8 = vsub.f32 %v200_v0, %v1272_v3  ;;  %v1288_v9 = vsub.f32 %v199_v1, %v1274_v4  ;;  %v1291_v10 = vsub.f32 %v198_v2, %v1276_v5  ;;  %v172_v19 = vld [vmem:[%s169_s9] sm:$0xff]  ;;  %v173_v20 = vld [vmem:[%s169_s9 + $0x8] sm:$0xff]  ;;  %v174_v21 = vld [vmem:[%s169_s9 + $0x10] sm:$0xff]  ;;  %s1133_s4 = sshll.u32 %s1191_s30, 4  ;;  %s1134_s4 = int_to_ptr.vmem [resolvable:$false] %s1133_s4 }
  0x17   : > { %997 = vmatpush3.msra.mxu0 %v1272_v3  ;;  %v1295_v11 = vsub.f32 %v197_v6, %v1281_v7  ;;  %v202_v23 = vsel %vm180_vm0, %v172_v19, 0  ;;  %v205_v24 = vsel %vm180_vm0, %v173_v20, 0  ;;  %v208_v25 = vsel %vm180_vm0, %v174_v21, 0  ;;  %v1327_v26 = vld [vmem:[%s169_s9 + $0x18] sm:$0xff]  ;;  %p1132_p13 = pneg %p1131_p12  ;;  %s1135_s5 = scalar_lea.vmem %s1134_s4, 1024 }
  0x18   : > { %v1298_v12 = vand.u32 4294901760, %v1285_v8  ;;  %998 = vmatprep.subr.mxu0 %v1274_v4  ;;  %v1302_v13 = vand.u32 4294901760, %v1288_v9  ;;  %v1305_v14 = vand.u32 4294901760, %v1291_v10  ;;  %v1330_v29 = vand.u32 4294901760, %v202_v23  ;;  %p1136_p0 = scmp.lt.s32.totalorder %s1405_s25, %s1134_s4  ;;  %p1137_p1 = scmp.lt.s32.totalorder %s1135_s5, %s1129_s16 }
  0x19   : > { %999 = vmatpush3.msra.mxu0 %v1274_v4  ;;  %v1309_v15 = vand.u32 4294901760, %v1295_v11  ;;  %v1333_v31 = vand.u32 4294901760, %v205_v24  ;;  %v1335_v32 = vand.u32 4294901760, %v208_v25  ;;  %v211_v33 = vsel %vm180_vm0, %v1327_v26, 0 }
  0x1a   : > { %v350_v16 = vsub.f32 %v1285_v8, %v1298_v12  ;;  %v357_v17 = vsub.f32 %v1288_v9, %v1302_v13  ;;  %1000 = vmatprep.subr.mxu0 %v1276_v5  ;;  %v364_v18 = vsub.f32 %v1291_v10, %v1305_v14  ;;  %v283_v34 = vsub.f32 %v202_v23, %v1330_v29  ;;  %p1138_p2 = por %p1137_p1, %p1136_p0 }
  0x1b   : > { %1001 = vmatpush3.msra.mxu0 %v1276_v5  ;;  %v371_v22 = vsub.f32 %v1295_v11, %v1309_v15  ;;  %1018 = vmatprep.mubr.f32.mxu1 %v1330_v29  ;;  %v1341_v35 = vand.u32 4294901760, %v211_v33  ;;  %v176_v36 = vmul.f32 %v172_v19, %v172_v19  ;;  %v178_v37 = vmul.f32 %v174_v21, %v174_v21 }
  0x1c   : > { %v351_v27 = vand.u32 4294901760, %v350_v16  ;;  %v358_v28 = vand.u32 4294901760, %v357_v17  ;;  %1002 = vmatprep.subr.mxu0 %v1281_v7  ;;  %v365_v30 = vand.u32 4294901760, %v364_v18  ;;  %v293_v39 = vsub.f32 %v205_v24, %v1333_v31  ;;  %p1139_p3 = pnand %p1138_p2, %p1132_p13 }
  0x1d   : > { %1003 = vmatpush3.msra.mxu0 %v1281_v7  ;;  %v372_v38 = vand.u32 4294901760, %v371_v22  ;;  %v303_v40 = vsub.f32 %v208_v25, %v1335_v32  ;;  %v177_v41 = vmul.f32 %v173_v20, %v173_v20  ;;  %v284_v42 = vand.u32 4294901760, %v283_v34  ;;  %v941_v22 = vld [vmem:[%s1449_s2] ss:$0 sm:$0xff] }
  0x1e   : > { %1010 = vmatprep.subr.mxu1 %v351_v27  ;;  %1024 = vmatprep.subr.mxu0 %v1285_v8  ;;  %v313_v43 = vsub.f32 %v211_v33, %v1341_v35  ;;  %v181_v44 = vsel %vm180_vm0, %v176_v36, 0.0  ;;  %v187_v45 = vsel %vm180_vm0, %v178_v37, 0.0  ;;  %v294_v46 = vand.u32 4294901760, %v293_v39 }
  0x1f   : > { %1011 = vmatpush3.msra.mxu1 %v351_v27  ;;  %v304_v47 = vand.u32 4294901760, %v303_v40  ;;  %182 = vadd.xlane.f32.xlu0 %v181_v44  ;;  %v285_v48 = vsub.f32 %v283_v34, %v284_v42  ;;  %v184_v50 = vsel %vm180_vm0, %v177_v41, 0.0  ;;  %v179_v58 = vmul.f32 %v1327_v26, %v1327_v26 }
  0x20   : > { %1012 = vmatprep.subr.mxu1 %v358_v28  ;;  %v314_v49 = vand.u32 4294901760, %v313_v43  ;;  %188 = vadd.xlane.f32.xlu1 %v187_v45  ;;  %v295_v51 = vsub.f32 %v293_v39, %v294_v46 }
  0x21   : > { %1013 = vmatpush3.msra.mxu1 %v358_v28  ;;  %v305_v52 = vsub.f32 %v303_v40, %v304_v47  ;;  %v286_v53 = vand.u32 4294901760, %v285_v48  ;;  %v190_v59 = vsel %vm180_vm0, %v179_v58, 0.0 }
  0x22   : > { %1014 = vmatprep.subr.mxu1 %v365_v30  ;;  %v315_v54 = vsub.f32 %v313_v43, %v314_v49  ;;  %v296_v55 = vand.u32 4294901760, %v295_v51 }
  0x23   : > { %1015 = vmatpush3.msra.mxu1 %v365_v30  ;;  %185 = vadd.xlane.f32.xlu0 %v184_v50  ;;  %v306_v56 = vand.u32 4294901760, %v305_v52 }
  0x24   : > { %1016 = vmatprep.subr.mxu1 %v372_v38  ;;  %1004 = vmatprep.mubr.f32.mxu0 %v286_v53  ;;  %v316_v57 = vand.u32 4294901760, %v315_v54 }
  0x25   : > { %1017 = vmatpush3.msra.mxu1 %v372_v38  ;;  %1005 = vmatmul.mubr.f32.vlgmr.msra.gmra.mxu0 %v296_v55 }
  0x26   : > { %1019 = vmatmul.mubr.f32.vlgmr.msra.gmra.mxu1 %v1333_v31  ;;  %1038 = vmatprep.subr.mxu1 %v1272_v3 }
  0x27   : > { %1025 = vmatpush3.msra.mxu0 %v1285_v8  ;;  %1039 = vmatpush3.msra.mxu1 %v1272_v3 }
  0x28   : > { %1026 = vmatprep.subr.mxu0 %v1288_v9  ;;  %1040 = vmatprep.subr.mxu1 %v1274_v4 }
  0x29   : > { %1027 = vmatpush3.msra.mxu0 %v1288_v9  ;;  %1007 = vmatprep.mubr.f32.mxu0 %v306_v56 }
  0x2a   : > { %1021 = vmatprep.mubr.f32.mxu1 %v1335_v32  ;;  %1028 = vmatprep.subr.mxu0 %v1291_v10 }
  0x2b   : > { %1041 = vmatpush3.msra.mxu1 %v1274_v4  ;;  %1008 = vmatmul.mubr.f32.gmra.mxu0 %v316_v57 }
  0x2c   : > { %1022 = vmatmul.mubr.f32.gmra.mxu1 %v1341_v35  ;;  %1029 = vmatpush3.msra.mxu0 %v1291_v10 }
  0x2d   : > { %1042 = vmatprep.subr.mxu1 %v1276_v5  ;;  %1030 = vmatprep.subr.mxu0 %v1295_v11 }
  0x2e   : > { %1043 = vmatpush3.msra.mxu1 %v1276_v5  ;;  %1031 = vmatpush3.msra.mxu0 %v1295_v11 }
  0x2f   : > { %1044 = vmatprep.subr.mxu1 %v1281_v7  ;;  %1032 = vmatprep.mubr.f32.mxu0 %v283_v34 }
  0x30   : > { %1045 = vmatpush3.msra.mxu1 %v1281_v7  ;;  %1046 = vmatprep.mubr.f32.mxu1 %v284_v42 }
  0x31   : > { %1052 = vmatprep.subr.mxu0 %v1298_v12  ;;  %1033 = vmatmul.mubr.f32.vlgmr.msra.gmra.mxu0 %v293_v39 }
  0x32   : > { %1047 = vmatmul.mubr.f32.vlgmr.msra.gmra.mxu1 %v294_v46  ;;  %1053 = vmatpush3.msra.mxu0 %v1298_v12 }
  0x33   : > { %1066 = vmatprep.subr.mxu1 %v1272_v3  ;;  %1054 = vmatprep.subr.mxu0 %v1302_v13 }
  0x34   : > { %1067 = vmatpush3.msra.mxu1 %v1272_v3  ;;  %1055 = vmatpush3.msra.mxu0 %v1302_v13 }
  0x35   : > { %1068 = vmatprep.subr.mxu1 %v1274_v4  ;;  %1035 = vmatprep.mubr.f32.mxu0 %v303_v40 }
  0x36   : > { %1049 = vmatprep.mubr.f32.mxu1 %v304_v47  ;;  %1056 = vmatprep.subr.mxu0 %v1305_v14 }
  0x37   : > { %1069 = vmatpush3.msra.mxu1 %v1274_v4  ;;  %1036 = vmatmul.mubr.f32.gmra.mxu0 %v313_v43 }
  0x38   : > { %1050 = vmatmul.mubr.f32.gmra.mxu1 %v314_v49  ;;  %1057 = vmatpush3.msra.mxu0 %v1305_v14 }
  0x39   : > { %1070 = vmatprep.subr.mxu1 %v1276_v5  ;;  %1058 = vmatprep.subr.mxu0 %v1309_v15 }
  0x3a   : > { %1071 = vmatpush3.msra.mxu1 %v1276_v5  ;;  %1059 = vmatpush3.msra.mxu0 %v1309_v15 }
  0x3b   : > { %1072 = vmatprep.subr.mxu1 %v1281_v7  ;;  %1060 = vmatprep.mubr.f32.mxu0 %v1330_v29 }
  0x3c   : > { %1073 = vmatpush3.msra.mxu1 %v1281_v7  ;;  %1074 = vmatprep.mubr.f32.mxu1 %v1330_v29 }
  0x3d   : > { %1061 = vmatmul.mubr.f32.vlgmr.msra.gmra.mxu0 %v1333_v31  ;;  %1075 = vmatmul.mubr.f32.vlgmr.msra.gmra.mxu1 %v1333_v31 }
  0x3e   : > { %1063 = vmatprep.mubr.f32.mxu0 %v1335_v32  ;;  %1077 = vmatprep.mubr.f32.mxu1 %v1335_v32 }
  0x3f   : > { %191 = vadd.xlane.f32.xlu1 %v190_v59 }
  0x41   : > { %1064 = vmatmul.mubr.f32.gmra.mxu0 %v1341_v35  ;;  %1078 = vmatmul.mubr.f32.gmra.mxu1 %v1341_v35 }
  0xa8   : > { %v183_v5 = vpop.xlane.xlu0 %182 }
  0xa9   : > { %v189_v9 = vpop.xlane.xlu1 %188  ;;  %v193_v26 = vmul.f32 -0.22222222, %v183_v5 }
  0xaa   : > { %v195_v40 = vmul.f32 -0.22222222, %v189_v9 }
  0xab   : > { %v834_v37 = vadd.f32 %v941_v22, %v193_v26 }
  0xac   : > { %v186_v12 = vpop.xlane.xlu0 %185  ;;  %v836_v53 = vadd.f32 %v941_v22, %v195_v40 }
  0xad   : > { %v194_v20 = vmul.f32 -0.22222222, %v186_v12 }
  0xaf   : > { %v835_v33 = vadd.f32 %v941_v22, %v194_v20 }
  0xc8   : > { %v192_v21 = vpop.xlane.xlu1 %191 }
  0xc9   : > { %v196_v29 = vmul.f32 -0.22222222, %v192_v21 }
  0xcb   : > { %v837_v41 = vadd.f32 %v941_v22, %v196_v29 }
  0xe5   : > { %v1006_v61 = vpop.f32.mrf.mxu0 }
  0xe6   : > { %v1020_v60 = vpop.f32.mrf.mxu1 }
  0xe7   : > { %v288_v62 = vpop.f32.mrf.mxu0  ;;  %v416_v10 = vadd.f32 %v1020_v60, %v1006_v61 }
  0xe8   : > { %v409_v63 = vpop.f32.mrf.mxu1 }
  0xe9   : > { %v410_v13 = vadd.f32 %v409_v63, %v288_v62 }
  0xeb   : > { %v1009_v0 = vpop.f32.mrf.mxu0 }
  0xec   : > { %v1023_v1 = vpop.f32.mrf.mxu1 }
  0xed   : > { %v308_v2 = vpop.f32.mrf.mxu0  ;;  %v428_v17 = vadd.f32 %v1023_v1, %v1009_v0 }
  0xee   : > { %v421_v3 = vpop.f32.mrf.mxu1 }
  0xef   : > { %v422_v23 = vadd.f32 %v421_v3, %v308_v2 }
  0xf1   : > { %v1034_v4 = vpop.f32.mrf.mxu0 }
  0xf2   : > { %v1048_v6 = vpop.f32.mrf.mxu1  ;;  %v515_v14 = vadd.f32 %v1034_v4, %v416_v10 }
  0xf3   : > { %v507_v7 = vpop.f32.mrf.mxu0 }
  0xf4   : > { %v605_v8 = vpop.f32.mrf.mxu1  ;;  %v508_v18 = vadd.f32 %v507_v7, %v410_v13  ;;  %v614_v24 = vadd.f32 %v1048_v6, %v515_v14 }
  0xf6   : > { %v606_v30 = vadd.f32 %v605_v8, %v508_v18 }
  0xf7   : > { %v1037_v11 = vpop.f32.mrf.mxu0 }
  0xf8   : > { %v1051_v15 = vpop.f32.mrf.mxu1  ;;  %v529_v25 = vadd.f32 %v1037_v11, %v428_v17 }
  0xf9   : > { %v521_v16 = vpop.f32.mrf.mxu0 }
  0xfa   : > { %v621_v19 = vpop.f32.mrf.mxu1  ;;  %v522_v31 = vadd.f32 %v521_v16, %v422_v23  ;;  %v630_v36 = vadd.f32 %v1051_v15, %v529_v25 }
  0xfc   : > { %v622_v44 = vadd.f32 %v621_v19, %v522_v31 }
  0xfd   : > { %v1062_v27 = vpop.f32.mrf.mxu0  ;;  %v1076_v28 = vpop.f32.mrf.mxu1 }
  0xfe   : > { %v719_v32 = vadd.f32 %v1062_v27, %v614_v24 }
  0xff   : > { %v712_v34 = vpop.f32.mrf.mxu0  ;;  %v805_v35 = vpop.f32.mrf.mxu1 }
 0x100   : > { %v812_v38 = vadd.f32 %v1076_v28, %v719_v32  ;;  %v713_v39 = vadd.f32 %v712_v34, %v606_v30 }
 0x101   : > { %v1065_v42 = vpop.f32.mrf.mxu0  ;;  %v1079_v43 = vpop.f32.mrf.mxu1 }
 0x102   : > { %v839_v45 = vadd.f32 %v835_v33, %v812_v38  ;;  %v806_v46 = vadd.f32 %v805_v35, %v713_v39  ;;  %v731_v47 = vadd.f32 %v1065_v42, %v630_v36 }
 0x103   : > { %v724_v48 = vpop.f32.mrf.mxu0  ;;  %v817_v54 = vpop.f32.mrf.mxu1 }
 0x104   : > { %v843_v49 = vmin.f32 %v839_v45, 0.0  ;;  %v838_v50 = vadd.f32 %v834_v37, %v806_v46  ;;  %v824_v51 = vadd.f32 %v1079_v43, %v731_v47  ;;  %v725_v52 = vadd.f32 %v724_v48, %v622_v44 }
 0x106   : > { %v848_v55 = vmul.f32 1.442695, %v843_v49  ;;  %v842_v56 = vmin.f32 %v838_v50, 0.0  ;;  %v841_v57 = vadd.f32 %v837_v41, %v824_v51  ;;  %v818_v58 = vadd.f32 %v817_v54, %v725_v52 }
 0x108   : > { %1121 = vpow2.f32 %v848_v55  ;;  %v846_v59 = vmul.f32 1.442695, %v842_v56  ;;  %v845_v60 = vmin.f32 %v841_v57, 0.0  ;;  %v840_v61 = vadd.f32 %v836_v53, %v818_v58 }
 0x10a   : > { %1123 = vpow2.f32 %v846_v59  ;;  %v852_v62 = vmul.f32 1.442695, %v845_v60  ;;  %v844_v63 = vmin.f32 %v840_v61, 0.0 }
 0x10c   : > { %1125 = vpow2.f32 %v852_v62  ;;  %v850_v0 = vmul.f32 1.442695, %v844_v63 }
 0x10e   : > { %1127 = vpow2.f32 %v850_v0 }
 0x115   : > { %v1122_v1 = vpop.eup %1121 }
 0x116   : > { %855 = vst [vmem:[%s164_s20 + $0x8] sm:$0xff] %v1122_v1 }
 0x117   : > { %v1124_v2 = vpop.eup %1123 }
 0x118   : > { %854 = vst [vmem:[%s164_s20] sm:$0xff] %v1124_v2 }
 0x119   : > { %v1126_v3 = vpop.eup %1125 }
 0x11a   : > { %857 = vst [vmem:[%s164_s20 + $0x18] sm:$0xff] %v1126_v3 }
 0x11b   : > { %v1128_v4 = vpop.eup %1127 }
 0x11c   : > { %856 = vst [vmem:[%s164_s20 + $0x10] sm:$0xff] %v1128_v4 }
 0x11d   : > { %1142 = shalt.err (!%p1139_p3)
}
 0x11e   : > { %s1143_s6 = scalar_lea.hbm %s1403_s28, 512  ;;  %s1147_s9 = scalar_lea.hbm %s1450_s3, 1024 }
 0x11f   : > { %p1144_p4 = scmp.ne.s32.totalorder %s1403_s28, %s1143_s6  ;;  %p1148_p9 = scmp.lt.s32.totalorder %s1403_s28, %s1450_s3 }
 0x120   : > { %p1149_p10 = scmp.lt.s32.totalorder %s1147_s9, %s1143_s6 }
 0x121   : > { %p1145_p7 = pnand %p1144_p4, %p1252_p5 }
 0x122   : > { %p1150_p11 = por %p1149_p10, %p1148_p9 }
 0x123   : > { %p1146_p8 = pneg %p1145_p7 }
 0x125   : > { %p1151_p12 = pnand %p1150_p11, %p1146_p8 }
 0x127   : > { %1154 = shalt.err (!%p1151_p12)
}
 0x128   : > { %s1192_s17 = smov 128   ;;  %s1193_s19 = smov 8  }
 0x129   : > { %1080 = dma.vmem_to_hbm [thread:$0]  (%p1252_p5), %s1405_s25, 512, %s1403_s28, %s1407_s29, %s1192_s17, %s1192_s17, %s1193_s19  }
 0x12a PF: > { %p1086_p13 = scmp.ge.s32.totalorder %s1189_s15, 2  ;;  %s887_s20 = sand.u32 1, %s1177_s12  }
 0x12b   : > { %s888_s24 = scalar_lea.sflag [#allocation3], %s887_s20 }
 0x12c   : > { %p1083_p0 = pnand %p1086_p13, %p1256_p6 }
 0x12e   : > { %p1084_p1 = pneg %p1083_p0 }
 0x130   : > { %1172 = dma.done.wait (%p1084_p1), %s888_s24, 512  }
 0x131   : > { %1174 = vsyncadd (%p1084_p1), %s888_s24, 4294966784  ;;  %p13_p2 = scmp.ge.s32.totalorder %s1239_s18, 4   ;;  %s1453_s12 = smov %s1181_s13 }
 0x132   : > { %s1454_s13 = smov %s1185_s14  ;;  %s1455_s14 = smov %s1250_s21 }
 0x133   : > { %s1456_s15 = smov %s1239_s18  ;;  %15 = sbr.rel (!%p13_p2) target bundleno = 3 (0x3), region = 67 }
 0x138   :  { %893 = vsyncpa [#allocation3], 1 }
 0x139   :  { %895 = vsyncpa [#allocation3 + $0x1], 1 }

</bundles_post_ra>
